<compile_context>
chip_gen: v7x
topology: tpu7x:2x2x1
jax: 0.10.0
libtpu: 0.0.40
codegen_flags: <defaults>
</compile_context>

<pallas_src>
import functools

import jax
import jax.numpy as jnp
from jax.experimental import pallas as pl
from jax.experimental.pallas import tpu as pltpu


def logpower_kernel(coefs_ref, x_ref, o_ref):
    # coefs_ref lives in SMEM: [a, b, c]; forward uses only b and c
    # (matching the PyTorch module, which ignores `a` / x**a).
    b = coefs_ref[1]
    c = coefs_ref[2]
    # Compute in f32 regardless of input dtype (v5e has no bf16 VPU/EUP path);
    # cast once on the final store.
    u = jnp.log1p(x_ref[...].astype(jnp.float32))

    @pl.when(c == 1.0)
    def _():  # default c: one transcendental per element (no pow)
        o_ref[...] = (b * u).astype(o_ref.dtype)

    @pl.when(jnp.logical_and(c != 1.0, c == 2.0))
    def _():  # square on the VPU instead of pow on the EUP
        o_ref[...] = (b * (u * u)).astype(o_ref.dtype)

    @pl.when(jnp.logical_and(c != 1.0, c != 2.0))
    def _():  # general path: pow lowers to exp(c * log(u)) on the EUP
        o_ref[...] = (b * (u ** c)).astype(o_ref.dtype)


@functools.partial(jax.jit, static_argnames=("block_rows",))
def logpower(x, coefs, *, block_rows=1024):
    """x: (N, C, H, W) float32; coefs: (3,) float32 -> same shape/dtype as x."""
    n, ch, h, w = x.shape
    m, l = n * ch, h * w            # lane-dense 2-D view; l = 256 (multiple of 128)
    x2 = x.reshape(m, l)
    tm = min(block_rows, m)         # 512-1024-row tiles at production sizes;
    grid = (pl.cdiv(m, tm),)        # (tm, l) f32 << 32 MiB scoped VMEM even on v7x
    out2 = pl.pallas_call(
        logpower_kernel,
        out_shape=jax.ShapeDtypeStruct((m, l), x2.dtype),
        grid=grid,
        in_specs=[
            pl.BlockSpec(memory_space=pltpu.MemorySpace.SMEM),   # coefs (3,)
            pl.BlockSpec((tm, l), lambda i: (i, 0)),             # row tile
        ],
        out_specs=pl.BlockSpec((tm, l), lambda i: (i, 0)),
        input_output_aliases={1: 0},   # pure map: reuse x's buffer for the output
        compiler_params=pltpu.CompilerParams(
            dimension_semantics=("parallel",),   # shards rows across 2 TCs on v7x
        ),
    )(coefs, x2)
    return out2.reshape(n, ch, h, w)


if __name__ == "__main__":
    # Deterministic parameter init per module __init__ defaults: a=1.0, b=0.01, c=1.0
    coefs = jnp.array([1.0, 0.01, 1.0], dtype=jnp.float32)

    key = jax.random.PRNGKey(0)
    # Positive inputs so log(1+x) is well defined (x <= -1 would NaN/inf, same as torch).
    x = jax.random.uniform(key, (2, 4, 16, 16), dtype=jnp.float32)

    out = jax.block_until_ready(logpower(x, coefs))

    # Reference: PyTorch forward semantics (log1p is the accuracy-improved log(1+x)).
    ref = coefs[1] * jnp.log1p(x) ** coefs[2]
    assert out.shape == x.shape and out.dtype == x.dtype
    assert jnp.allclose(out, ref, atol=1e-6, rtol=1e-5)

    print("KERNEL_OK")
</pallas_src>

<mosaic_0001>
module attributes {stable_mosaic.version = 11 : i64} {
  func.func @logpower_kernel(%arg0: i32, %arg1: memref<3xf32, #tpu.memory_space<smem>>, %arg2: memref<8x256xf32, #tpu.memory_space<vmem>>, %arg3: memref<8x256xf32, #tpu.memory_space<vmem>>) attributes {dimension_semantics = [#tpu.dimension_semantics<parallel>], iteration_bounds = array<i64: 1>, scalar_prefetch = 0 : i64, scratch_operands = 0 : i64, tpu.core_type = #tpu.core_type<tc>, window_params = [{transform_indices = @transform_0, window_bounds = array<i64: 3>}, {transform_indices = @transform_1, window_bounds = array<i64: 8, 256>}, {transform_indices = @transform_2, window_bounds = array<i64: 8, 256>}]} {
    %c1 = arith.constant 1 : index
    %0 = memref.load %arg1[%c1] : memref<3xf32, #tpu.memory_space<smem>>
    %c2 = arith.constant 2 : index
    %1 = memref.load %arg1[%c2] : memref<3xf32, #tpu.memory_space<smem>>
    %c0 = arith.constant 0 : index
    %c0_0 = arith.constant 0 : index
    %2 = vector.load %arg2[%c0, %c0_0] : memref<8x256xf32, #tpu.memory_space<vmem>>, vector<8x256xf32>
    %3 = math.log1p %2 : vector<8x256xf32>
    %cst = arith.constant 1.000000e+00 : f32
    %4 = arith.cmpf oeq, %1, %cst : f32
    %5 = arith.extui %4 : i1 to i32
    %c0_i32 = arith.constant 0 : i32
    %6 = arith.cmpi ne, %5, %c0_i32 : i32
    scf.if %6 {
      %17 = vector.broadcast %0 : f32 to vector<8x256xf32>
      %18 = arith.mulf %17, %3 : vector<8x256xf32>
      %c0_7 = arith.constant 0 : index
      %c0_8 = arith.constant 0 : index
      %19 = vector.load %arg3[%c0_7, %c0_8] : memref<8x256xf32, #tpu.memory_space<vmem>>, vector<8x256xf32>
      tpu.vector_store %arg3[%c0_7, %c0_8], %18 {strides = array<i32>} : memref<8x256xf32, #tpu.memory_space<vmem>>, vector<8x256xf32>,
    } else {
    }
    %cst_1 = arith.constant 1.000000e+00 : f32
    %7 = arith.cmpf one, %1, %cst_1 : f32
    %cst_2 = arith.constant 2.000000e+00 : f32
    %8 = arith.cmpf oeq, %1, %cst_2 : f32
    %9 = arith.andi %7, %8 : i1
    %10 = arith.extui %9 : i1 to i32
    %c0_i32_3 = arith.constant 0 : i32
    %11 = arith.cmpi ne, %10, %c0_i32_3 : i32
    scf.if %11 {
      %17 = arith.mulf %3, %3 : vector<8x256xf32>
      %18 = vector.broadcast %0 : f32 to vector<8x256xf32>
      %19 = arith.mulf %18, %17 : vector<8x256xf32>
      %c0_7 = arith.constant 0 : index
      %c0_8 = arith.constant 0 : index
      %20 = vector.load %arg3[%c0_7, %c0_8] : memref<8x256xf32, #tpu.memory_space<vmem>>, vector<8x256xf32>
      tpu.vector_store %arg3[%c0_7, %c0_8], %19 {strides = array<i32>} : memref<8x256xf32, #tpu.memory_space<vmem>>, vector<8x256xf32>,
    } else {
    }
    %cst_4 = arith.constant 1.000000e+00 : f32
    %12 = arith.cmpf one, %1, %cst_4 : f32
    %cst_5 = arith.constant 2.000000e+00 : f32
    %13 = arith.cmpf one, %1, %cst_5 : f32
    %14 = arith.andi %12, %13 : i1
    %15 = arith.extui %14 : i1 to i32
    %c0_i32_6 = arith.constant 0 : i32
    %16 = arith.cmpi ne, %15, %c0_i32_6 : i32
    scf.if %16 {
      %17 = vector.broadcast %1 : f32 to vector<8x256xf32>
      %18 = math.powf %3, %17 : vector<8x256xf32>
      %19 = vector.broadcast %0 : f32 to vector<8x256xf32>
      %20 = arith.mulf %19, %18 : vector<8x256xf32>
      %c0_7 = arith.constant 0 : index
      %c0_8 = arith.constant 0 : index
      %21 = vector.load %arg3[%c0_7, %c0_8] : memref<8x256xf32, #tpu.memory_space<vmem>>, vector<8x256xf32>
      tpu.vector_store %arg3[%c0_7, %c0_8], %20 {strides = array<i32>} : memref<8x256xf32, #tpu.memory_space<vmem>>, vector<8x256xf32>,
    } else {
    }
    return
  }
  func.func @transform_0(%arg0: i32) -> i32 {
    %c0_i32 = arith.constant 0 : i32
    %c0_i32_0 = arith.constant 0 : i32
    return %c0_i32 : i32
  }
  func.func @transform_1(%arg0: i32) -> (i32, i32) {
    %c0_i32 = arith.constant 0 : i32
    %c0_i32_0 = arith.constant 0 : i32
    return %arg0, %c0_i32 : i32, i32
  }
  func.func @transform_2(%arg0: i32) -> (i32, i32) {
    %c0_i32 = arith.constant 0 : i32
    %c0_i32_0 = arith.constant 0 : i32
    return %arg0, %c0_i32 : i32, i32
  }
}

</mosaic_0001>

<bundles_post_ra>
// kernel: logpower.1
= control target key start
LH: loop header
LB: loop body
LE: loop exit
PB: predicated region body
PF: predicated region fallthrough
CT: control target
= control target key end

     0   :  { %7 = vsyncpa [#allocation3], 0  ;;  %s443_s0 = inlined_call_operand.vmem [shape: f32[3], index: 0, kind: input, shape index: {}]   ;;  %s444_s1 = inlined_call_operand.vmem [shape: f32[8,256], index: 1, kind: input, shape index: {}, may-alias: {1,2}]   ;;  %s445_s2 = inlined_call_operand.vmem [shape: f32[8,256], index: 2, kind: output, shape index: {}, may-alias: {1,2}]  }
   0x1   :  { %s14_s11 = sshll.u32 %s443_s0, 4  ;;  %s15_s11 = int_to_ptr.vmem [resolvable:$true] %s14_s11 }
   0x2   :  { %s207_s12 = scalar_lea.vmem %s15_s11, 16  ;;  %p212_p1 = scmp.lt.s32.totalorder %s15_s11, %s15_s11 }
   0x3   :  { %p208_p0 = scmp.ne.s32.totalorder %s15_s11, %s207_s12  ;;  %p213_p2 = scmp.lt.s32.totalorder %s207_s12, %s207_s12 }
   0x5   :  { %p214_p3 = por %p213_p2, %p212_p1 }
   0x7   :  { %p215_p4 = pnand %p214_p3, %p208_p0 }
   0x9   :  { %218 = shalt.err (!%p215_p4)
}
   0xa   :  { %s221_s13 = smov [#allocation2]  }
   0xb   :  { %17 = dma.vmem_to_smem %s15_s11, 16, %s221_s13, [#allocation3]  }
   0xc   :  { %219 = dma.done.wait [#allocation3], 16  }
   0xd   :  { %220 = vsyncadd [#allocation3], 4294967280 }
   0xe   :  { %23 = sfence }
   0xf   :  { %s242_s14 = sld [smem:[#allocation2 + $0x1]]  ;;  %s244_s15 = sld [smem:[#allocation2 + $0x2]]  ;;  %v26_v0 = vld [vmem:[%s444_s1] sm:$0xff]  ;;  %v27_v1 = vld [vmem:[%s444_s1 + $0x8] sm:$0xff] }
  0x10   :  { %v28_v2 = vadd.f32 1.0, %v26_v0  ;;  %v37_v3 = vadd.f32 1.0, %v27_v1  ;;  %v31_v4 = vmul.f32 -0.5, %v26_v0  ;;  %v40_v5 = vmul.f32 -0.5, %v27_v1 }
  0x11   :  { %v34_v7 = vand.u32 2147483647, %v26_v0  ;;  %v43_v9 = vand.u32 2147483647, %v27_v1 }
  0x12   :  { %195 = vlog2.f32 %v28_v2  ;;  %v32_v6 = vadd.f32 1.0, %v31_v4  ;;  %v41_v8 = vadd.f32 1.0, %v40_v5 }
  0x13   :  { %197 = vlog2.f32 %v37_v3  ;;  %vm35_vm0 = vcmp.lt.f32.partialorder %v34_v7, 0.0004427343  ;;  %vm44_vm1 = vcmp.lt.f32.partialorder %v43_v9, 0.0004427343 }
  0x14   :  { %v33_v10 = vmul.f32 %v32_v6, %v26_v0  ;;  %v42_v12 = vmul.f32 %v41_v8, %v27_v1 }
  0x15   :  { %p46_p5 = scmp.eq.f32.partialorder %s244_s15, 1.0 }
  0x16   :  { %v50_v18 = vstv (%p46_p5), %s242_s14 }
  0x1a   :  { %49 = sbr.rel (!%p46_p5) target bundleno = 36 (0x24), region = 17 }
  0x1c   :  { %v196_v11 = vpop.eup %195 }
  0x1d   :  { %v198_v13 = vpop.eup %197  ;;  %v30_v14 = vmul.f32 0.6931472, %v196_v11 }
  0x1e   :  { %v39_v15 = vmul.f32 0.6931472, %v198_v13 }
  0x1f   :  { %v253_v16 = vsel %vm35_vm0, %v33_v10, %v30_v14 }
  0x20   :  { %v255_v17 = vsel %vm44_vm1, %v42_v12, %v39_v15  ;;  %v51_v19 = vmul.f32 (%p46_p5), %v50_v18, %v253_v16 }
  0x21   :  { %v52_v20 = vmul.f32 %v50_v18, %v255_v17 }
  0x22   :  { %53 = vst [vmem:[%s445_s2] sm:$0xff] %v51_v19 }
  0x23   :  { %54 = vst [vmem:[%s445_s2 + $0x8] sm:$0xff] %v52_v20 }
  0x24 PF:  { %p55_p6 = scmp.ne.f32.partialorder %s244_s15, 1.0  ;;  %p56_p7 = scmp.eq.f32.partialorder %s244_s15, 2.0 }
  0x26   :  { %p57_p8 = pnand %p56_p7, %p55_p6 }
  0x27   :  { %v61_v21 = vmul.f32 (!%p57_p8), %v253_v16, %v253_v16  ;;  %v63_v22 = vstv (!%p57_p8), %s242_s14  ;;  %v62_v23 = vmul.f32 (!%p57_p8), %v255_v17, %v255_v17 }
  0x28   :  { %60 = sbr.rel (%p57_p8) target bundleno = 47 (0x2f), region = 21 }
  0x29   :  { %v64_v24 = vmul.f32 (!%p57_p8), %v63_v22, %v61_v21  ;;  %v65_v25 = vmul.f32 (!%p57_p8), %v63_v22, %v62_v23 }
  0x2b   :  { %66 = vst [vmem:[%s445_s2] sm:$0xff] (!%p57_p8), %v64_v24  ;;  %67 = vst [vmem:[%s445_s2 + $0x8] sm:$0xff] (!%p57_p8), %v65_v25 }
  0x2f PF:  { %p68_p9 = scmp.ne.f32.partialorder %s244_s15, 2.0 }
  0x31   :  { %p69_p10 = pnand %p68_p9, %p55_p6 }
  0x32   :  { %v287_v26 = vstv (!%p69_p10), %s244_s15  ;;  %v290_v27 = vand.u32 (!%p69_p10), 2147483647, %v253_v16  ;;  %v298_v30 = vand.u32 (!%p69_p10), 2147483647, %v255_v17  ;;  %vm109_vm6 = vcmp.eq.f32.partialorder (!%p69_p10), %v253_v16, 0 }
  0x33   :  { %72 = sbr.rel (%p69_p10) target bundleno = 93 (0x5d), region = 25  ;;  %v293_v28 = vand.u32 (!%p69_p10), 2147483647, %v287_v26  ;;  %v97_v31 = vtrunc.f32 (!%p69_p10), %v287_v26  ;;  %vm96_vm5 = vcmp.lt.f32.partialorder (!%p69_p10), %v287_v26, 0  ;;  %vm108_vm10 = vcmp.lt.f32.partialorder (!%p69_p10), %v253_v16, 0 }
  0x34   :  { %199 = vlog2.f32 (!%p69_p10), %v290_v27  ;;  %vm112_vm7 = vcmp.gt.f32.partialorder (!%p69_p10), %v290_v27, 1065353216  ;;  %vm321_vm11 = vmand (!%p69_p10), %vm96_vm5, %vm109_vm6  ;;  %v222_v40 = vmov (!%p69_p10), 2139095040   ;;  %vm446_vm0 = vcmp.eq.f32.partialorder (!%p69_p10), %v255_v17, 0 }
  0x35   :  { %v101_v29 = vtrunc.f32 (!%p69_p10), %v293_v28  ;;  %201 = vlog2.f32 (!%p69_p10), %v298_v30  ;;  %vm93_vm2 = vcmp.eq.f32.partialorder (!%p69_p10), %v293_v28, 2139095040  ;;  %vm98_vm3 = vcmp.ne.f32.partialorder (!%p69_p10), %v287_v26, %v97_v31  ;;  %vm327_vm12 = vmxor (!%p69_p10), %vm96_vm5, %vm112_vm7 }
  0x36   :  { %vm307_vm4 = vmor (!%p69_p10), %vm98_vm3, %vm93_vm2  ;;  %v128_v41 = vsel (!%p69_p10), %vm96_vm5, 0, %v222_v40  ;;  %vm100_vm13 = vcmp.lt.f32.partialorder (!%p69_p10), %v293_v28, 1266679808  ;;  %vm164_vm3 = vcmp.gt.f32.partialorder (!%p69_p10), %v298_v30, 1065353216  ;;  %v223_v46 = vmov (!%p69_p10), 0  }
  0x37   :  { %v102_v32 = vcvt.f32.s32 (!%p69_p10), %v101_v29  ;;  %vm105_vm9 = vmneg (!%p69_p10), %vm307_vm4  ;;  %v129_v44 = vxor.u32 (!%p69_p10), 2147483648, %v128_v41  ;;  %v116_v47 = vsel (!%p69_p10), %vm96_vm5, 2139095040, %v223_v46  ;;  %v76_v2 = vstv (!%p69_p10), %s242_s14 }
  0x38   :  { %vm339_vm15 = vmand (!%p69_p10), %vm108_vm10, %vm307_vm4 }
  0x39   :  { %v103_v35 = vand.u32 (!%p69_p10), 1, %v102_v32  ;;  %vm123_vm1 = vmor (!%p69_p10), %vm321_vm11, %vm327_vm12  ;;  %vm125_vm11 = vcmp.eq.f32.partialorder (!%p69_p10), %v253_v16, 3212836864 }
  0x3a   :  { %v124_v50 = vsel %vm123_vm1, 2139095040, %v223_v46  ;;  %vm367_vm12 = vmxor %vm96_vm5, %vm164_vm3  ;;  %vm134_vm1 = vcmp.ne.f32.partialorder %v287_v26, %v287_v26  ;;  %vm94_vm3 = vcmp.eq.f32.partialorder %v287_v26, 0 }
  0x3b   :  { %vm104_vm8 = vcmp.eq.s32.totalorder %v103_v35, 1  ;;  %v126_v56 = vsel %vm125_vm11, 1065353216, %v124_v50 }
  0x3c   :  { %vm106_vm14 = vmand %vm104_vm8, %vm105_vm9  ;;  %vm111_vm8 = vcmp.lt.s32.totalorder %v253_v16, 0 }
  0x3d   :  { %vm349_vm7 = vmand %vm100_vm13, %vm106_vm14  ;;  %vm160_vm13 = vcmp.lt.f32.partialorder %v255_v17, 0 }
  0x3e   :  { %v200_v33 = vpop.eup %199  ;;  %vm360_vm9 = vmand %vm96_vm5, %vm446_vm0  ;;  %v130_v53 = vsel %vm349_vm7, %v129_v44, %v128_v41  ;;  %vm133_vm5 = vcmp.ne.f32.partialorder %v253_v16, %v253_v16 }
  0x3f   :  { %v90_v34 = vmul.f32 %v200_v33, %v287_v26  ;;  %v202_v37 = vpop.eup %201  ;;  %vm118_vm14 = vmand %vm111_vm8, %vm349_vm7  ;;  %vm113_vm8 = vcmp.eq.f32.partialorder %v290_v27, 2139095040  ;;  %v131_v57 = vsel %vm108_vm10, %v130_v53, %v128_v41  ;;  %v183_v8 = vsel %vm160_vm13, %v130_v53, %v128_v41 }
  0x40   :  { %v142_v42 = vmul.f32 %v202_v37, %v287_v26  ;;  %vm166_vm0 = vmand %vm160_vm13, %vm307_vm4  ;;  %vm177_vm4 = vcmp.eq.f32.partialorder %v255_v17, 3212836864 }
  0x41   :  { %203 = vpow2.f32 %v90_v34  ;;  %vm400_vm11 = vmor %vm133_vm5, %vm134_vm1 }
  0x42   :  { %205 = vpow2.f32 %v142_v42 }
  0x4b   :  { %v204_v49 = vpop.eup %203 }
  0x4c   :  { %v115_v52 = vsel %vm339_vm15, 2143289344, %v204_v49  ;;  %vm110_vm15 = vcmp.eq.f32.partialorder %v253_v16, 1065353216  ;;  %v206_v60 = vpop.eup %205 }
  0x4d   :  { %v117_v54 = vsel %vm109_vm6, %v116_v47, %v115_v52  ;;  %vm175_vm6 = vmor %vm360_vm9, %vm367_vm12  ;;  %vm163_vm9 = vcmp.lt.s32.totalorder %v255_v17, 0  ;;  %vm95_vm12 = vcmp.eq.f32.partialorder %v287_v26, 1065353216  ;;  %v167_v0 = vsel %vm166_vm0, 2143289344, %v206_v60 }
  0x4e   :  { %v119_v55 = vxor.u32 2147483648, %v117_v54  ;;  %vm137_vm10 = vmor %vm110_vm15, %vm94_vm3  ;;  %v176_v62 = vsel %vm175_vm6, 2139095040, %v223_v46  ;;  %vm185_vm15 = vcmp.ne.f32.partialorder %v255_v17, %v255_v17  ;;  %vm162_vm6 = vcmp.eq.f32.partialorder %v255_v17, 1065353216 }
  0x4f   :  { %vm170_vm5 = vmand %vm163_vm9, %vm349_vm7  ;;  %v178_v6 = vsel %vm177_vm4, 1065353216, %v176_v62  ;;  %vm165_vm0 = vcmp.eq.f32.partialorder %v298_v30, 2139095040 }
  0x50   :  { %v120_v58 = vsel %vm118_vm14, %v119_v55, %v117_v54  ;;  %vm463_vm14 = vcmp.eq.f32.partialorder %v255_v17, 0  ;;  %vm187_vm7 = vmor %vm185_vm15, %vm134_vm1 }
  0x51   :  { %v127_v61 = vsel %vm93_vm2, %v126_v56, %v120_v58  ;;  %v169_v3 = vsel %vm463_vm14, %v116_v47, %v167_v0 }
  0x52   :  { %v132_v63 = vsel %vm113_vm8, %v131_v57, %v127_v61  ;;  %v171_v5 = vxor.u32 2147483648, %v169_v3  ;;  %vm189_vm8 = vmor %vm162_vm6, %vm94_vm3 }
  0x53   :  { %v136_v1 = vsel %vm400_vm11, 2143289344, %v132_v63 }
  0x54   :  { %v138_v4 = vsel %vm137_vm10, 1065353216, %v136_v1  ;;  %v172_v10 = vsel %vm170_vm5, %v171_v5, %v169_v3 }
  0x55   :  { %v139_v7 = vsel %vm95_vm12, %v253_v16, %v138_v4  ;;  %v179_v11 = vsel %vm93_vm2, %v178_v6, %v172_v10 }
  0x56   :  { %v77_v9 = vmul.f32 %v139_v7, %v76_v2  ;;  %v184_v12 = vsel %vm165_vm0, %v183_v8, %v179_v11 }
  0x57   :  { %v188_v13 = vsel %vm187_vm7, 2143289344, %v184_v12 }
  0x58   :  { %79 = vst [vmem:[%s445_s2] sm:$0xff] %v77_v9  ;;  %v190_v14 = vsel %vm189_vm8, 1065353216, %v188_v13 }
  0x59   :  { %v191_v15 = vsel %vm95_vm12, %v255_v17, %v190_v14 }
  0x5a   :  { %v78_v16 = vmul.f32 %v191_v15, %v76_v2 }
  0x5c   :  { %80 = vst [vmem:[%s445_s2 + $0x8] sm:$0xff] %v78_v16 }
  0x5d PF:  { %85 = vsyncpa [#allocation3], 1 }

</bundles_post_ra>
